<compile_context>
chip_gen: v6e
topology: v6e:2x2x1
jax: 0.10.0
libtpu: 0.0.40
codegen_flags: <defaults>
</compile_context>

<pallas_src>
import functools

import jax
import jax.numpy as jnp
from jax.experimental import pallas as pl
from jax.experimental.pallas import tpu as pltpu


# ---------------------------------------------------------------------------
# Kernel 1: fused all-head Q/K/V projection + per-head scaled dot-product attn
# ---------------------------------------------------------------------------
def _fused_attention_kernel(q_ref, k_ref, v_ref, wq_ref, wk_ref, wv_ref, o_ref,
                            *, n_heads, dim_q_k, dim_v):
    # Blocks: q (1,Q,Dm), k/v (1,S,Dm), wq/wk (Dm,H*Dqk), wv (Dm,H*Dv),
    #         out (1,Q,H*Dv).  All math kept in f32 (v5e VPU/EUP have no bf16).
    q = q_ref[0]
    k = k_ref[0]
    v = v_ref[0]

    # One lane-dense projection per tensor.  The softmax scale (dim_q_k^-0.5)
    # is pre-folded into wq, so qp already carries it.
    qp = jnp.dot(q, wq_ref[...], preferred_element_type=jnp.float32)   # (Q, H*Dqk)
    kp = jnp.dot(k, wk_ref[...], preferred_element_type=jnp.float32)   # (S, H*Dqk)
    vp = jnp.dot(v, wv_ref[...], preferred_element_type=jnp.float32)   # (S, H*Dv)

    # Per-head attention (static unroll; H is small).  Static slices are free.
    ctx_heads = []
    for h in range(n_heads):
        qh = qp[:, h * dim_q_k:(h + 1) * dim_q_k]                      # (Q, Dqk)
        kh = kp[:, h * dim_q_k:(h + 1) * dim_q_k]                      # (S, Dqk)
        vh = vp[:, h * dim_v:(h + 1) * dim_v]                          # (S, Dv)

        # Contract the shared last dim directly -> no explicit transpose of kh.
        s = jax.lax.dot_general(qh, kh, (((1,), (1,)), ((), ())),
                                preferred_element_type=jnp.float32)    # (Q, S)
        s = s - jnp.max(s, axis=-1, keepdims=True)
        e = jnp.exp(s)
        inv_denom = pl.reciprocal(jnp.sum(e, axis=-1, keepdims=True), approx=True)
        attn = e * inv_denom
        ctx_heads.append(jnp.dot(attn, vh, preferred_element_type=jnp.float32))

    # Head-major feature concat == torch `cat(context.split(batch, 0), dim=-1)`.
    o_ref[0] = jnp.concatenate(ctx_heads, axis=-1).astype(o_ref.dtype)


# ---------------------------------------------------------------------------
# Kernel 2: output Linear + bias + residual add + LayerNorm (row-tiled)
# ---------------------------------------------------------------------------
def _out_linear_ln_kernel(x_ref, res_ref, w_ref, b_ref, g_ref, be_ref, o_ref,
                          *, eps):
    # Blocks: x (Tr, H*Dv), res (Tr, Dm), w (H*Dv, Dm), b/gamma/beta (1, Dm).
    y = jnp.dot(x_ref[...], w_ref[...], preferred_element_type=jnp.float32)
    y = y + b_ref[...] + res_ref[...]

    mean = jnp.mean(y, axis=-1, keepdims=True)
    cent = y - mean
    var = jnp.mean(cent * cent, axis=-1, keepdims=True)
    out = cent * jax.lax.rsqrt(var + eps) * g_ref[...] + be_ref[...]
    o_ref[...] = out.astype(o_ref.dtype)


# ---------------------------------------------------------------------------
# Wrapper
# ---------------------------------------------------------------------------
def _pick_row_tile(n):
    """Largest power-of-two row tile (multiple of 8) that splits n into >=2 blocks."""
    for c in (512, 256, 128, 64, 32, 16, 8):
        if n % c == 0 and n // c >= 2:
            return c
    return n


def multi_head_attention(value, key, query, params):
    """Forward pass matching MultiHeadAttention.forward (mask=None, eval mode)."""
    B, S, Dm = value.shape
    Q = query.shape[1]
    n_heads = params["n_heads"]
    HDqk = params["wq_f"].shape[1]
    HDv = params["wv_f"].shape[1]
    dim_q_k = HDqk // n_heads
    dim_v = HDv // n_heads

    value = value.astype(jnp.float32)
    key = key.astype(jnp.float32)
    query = query.astype(jnp.float32)

    itemsize = 4  # f32

    # ---- Kernel 1: per-batch fused attention ----
    blk1 = itemsize * (Q * Dm + 2 * S * Dm + 2 * Dm * HDqk + Dm * HDv + Q * HDv)
    vmem1 = int(min(max(4 * blk1 + (1 << 20), 2 << 20), 48 << 20))
    flops1 = B * (2 * Q * Dm * HDqk + 2 * S * Dm * HDqk + 2 * S * Dm * HDv
                  + n_heads * (2 * Q * S * dim_q_k + 2 * Q * S * dim_v)
                  + 4 * n_heads * Q * S)
    bytes1 = itemsize * (B * (Q * Dm + 2 * S * Dm + Q * HDv)
                         + 2 * Dm * HDqk + Dm * HDv)

    ctx = pl.pallas_call(
        functools.partial(_fused_attention_kernel, n_heads=n_heads,
                          dim_q_k=dim_q_k, dim_v=dim_v),
        out_shape=jax.ShapeDtypeStruct((B, Q, HDv), jnp.float32),
        grid_spec=pltpu.PrefetchScalarGridSpec(
            num_scalar_prefetch=0,
            grid=(B,),
            in_specs=[
                pl.BlockSpec((1, Q, Dm), lambda b: (b, 0, 0)),
                pl.BlockSpec((1, S, Dm), lambda b: (b, 0, 0)),
                pl.BlockSpec((1, S, Dm), lambda b: (b, 0, 0)),
                pl.BlockSpec((Dm, HDqk), lambda b: (0, 0)),
                pl.BlockSpec((Dm, HDqk), lambda b: (0, 0)),
                pl.BlockSpec((Dm, HDv), lambda b: (0, 0)),
            ],
            out_specs=pl.BlockSpec((1, Q, HDv), lambda b: (b, 0, 0)),
        ),
        compiler_params=pltpu.CompilerParams(
            dimension_semantics=("parallel",),
            vmem_limit_bytes=vmem1),
        cost_estimate=pl.CostEstimate(
            flops=int(flops1),
            transcendentals=int(B * n_heads * Q * S),
            bytes_accessed=int(bytes1)),
    )(query, key, value, params["wq_f"], params["wk_f"], params["wv_f"])

    # ---- Kernel 2: output linear + residual + LayerNorm, row-tiled ----
    BQ = B * Q
    x_flat = ctx.reshape(BQ, HDv)          # already in (B, Q, H*Dv) layout
    res_flat = query.reshape(BQ, Dm)
    tile_r = _pick_row_tile(BQ)

    blk2 = itemsize * (tile_r * HDv + 2 * tile_r * Dm + HDv * Dm + 3 * Dm)
    vmem2 = int(min(max(4 * blk2 + (1 << 20), 2 << 20), 48 << 20))
    flops2 = 2 * BQ * HDv * Dm + 8 * BQ * Dm
    bytes2 = itemsize * (BQ * HDv + 2 * BQ * Dm + HDv * Dm + 3 * Dm)

    out_flat = pl.pallas_call(
        functools.partial(_out_linear_ln_kernel, eps=1e-12),
        out_shape=jax.ShapeDtypeStruct((BQ, Dm), jnp.float32),
        grid_spec=pltpu.PrefetchScalarGridSpec(
            num_scalar_prefetch=0,
            grid=(BQ // tile_r,),
            in_specs=[
                pl.BlockSpec((tile_r, HDv), lambda i: (i, 0)),
                pl.BlockSpec((tile_r, Dm), lambda i: (i, 0)),
                pl.BlockSpec((HDv, Dm), lambda i: (0, 0)),
                pl.BlockSpec((1, Dm), lambda i: (0, 0)),
                pl.BlockSpec((1, Dm), lambda i: (0, 0)),
                pl.BlockSpec((1, Dm), lambda i: (0, 0)),
            ],
            out_specs=pl.BlockSpec((tile_r, Dm), lambda i: (i, 0)),
        ),
        compiler_params=pltpu.CompilerParams(
            dimension_semantics=("parallel",),
            vmem_limit_bytes=vmem2),
        cost_estimate=pl.CostEstimate(
            flops=int(flops2),
            transcendentals=int(BQ),
            bytes_accessed=int(bytes2)),
    )(x_flat, res_flat, params["w_out"], params["b_out"],
      params["gamma"], params["beta"])

    return out_flat.reshape(B, Q, Dm)


# ---------------------------------------------------------------------------
# Parameter construction (mirrors the module's __init__)
# ---------------------------------------------------------------------------
def init_params(rng, n_heads, dim_m, dim_q_k, dim_v):
    """Deterministic init mirroring the module; returns kernel-ready layouts.

    Per-head projection weights are fused head-major along the last dim:
      wq_f[:, h*Dqk:(h+1)*Dqk] == wq[h]   (shape (Dm, H*Dqk))
    and the softmax scale dim_q_k**-0.5 is folded into wq_f.
    The output Linear weight is stored pre-transposed as (H*Dv, Dm).
    """
    k1, k2, k3, k4, k5 = jax.random.split(rng, 5)
    # kaiming_normal_ on (H, Dm, Dproj): fan_in = Dm * Dproj, gain = sqrt(2)
    std_qk = (2.0 / (dim_m * dim_q_k)) ** 0.5
    std_v = (2.0 / (dim_m * dim_v)) ** 0.5
    wq = std_qk * jax.random.normal(k1, (n_heads, dim_m, dim_q_k), jnp.float32)
    wk = std_qk * jax.random.normal(k2, (n_heads, dim_m, dim_q_k), jnp.float32)
    wv = std_v * jax.random.normal(k3, (n_heads, dim_m, dim_v), jnp.float32)

    scale = float(dim_q_k) ** -0.5
    wq_f = jnp.transpose(wq, (1, 0, 2)).reshape(dim_m, n_heads * dim_q_k) * scale
    wk_f = jnp.transpose(wk, (1, 0, 2)).reshape(dim_m, n_heads * dim_q_k)
    wv_f = jnp.transpose(wv, (1, 0, 2)).reshape(dim_m, n_heads * dim_v)

    # nn.Linear(dim_v*n_heads, dim_m): store weight transposed -> (H*Dv, Dm)
    bound = 1.0 / (dim_v * n_heads) ** 0.5
    w_out = jax.random.uniform(k4, (dim_v * n_heads, dim_m), jnp.float32,
                               minval=-bound, maxval=bound)
    b_out = jax.random.uniform(k5, (1, dim_m), jnp.float32,
                               minval=-bound, maxval=bound)
    gamma = jnp.ones((1, dim_m), jnp.float32)
    beta = jnp.zeros((1, dim_m), jnp.float32)
    return dict(n_heads=n_heads,
                wq_f=wq_f, wk_f=wk_f, wv_f=wv_f,
                w_out=w_out, b_out=b_out, gamma=gamma, beta=beta)


if __name__ == "__main__":
    n_heads, dim_m, dim_q_k, dim_v = 4, 32, 16, 16
    B, S, Q = 2, 8, 8

    root = jax.random.PRNGKey(0)
    kp, kv, kk, kq = jax.random.split(root, 4)
    params = init_params(kp, n_heads, dim_m, dim_q_k, dim_v)

    value = jax.random.normal(kv, (B, S, dim_m), jnp.float32)
    key = jax.random.normal(kk, (B, S, dim_m), jnp.float32)
    query = jax.random.normal(kq, (B, Q, dim_m), jnp.float32)

    out = multi_head_attention(value, key, query, params)
    jax.block_until_ready(out)
    assert out.shape == (B, Q, dim_m)
    print("KERNEL_OK")
</pallas_src>

<mosaic_0001>
module attributes {stable_mosaic.version = 11 : i64} {
  func.func @_fused_attention_kernel(%arg0: i32, %arg1: memref<1x8x32xf32, #tpu.memory_space<vmem>>, %arg2: memref<1x8x32xf32, #tpu.memory_space<vmem>>, %arg3: memref<1x8x32xf32, #tpu.memory_space<vmem>>, %arg4: memref<32x64xf32, #tpu.memory_space<vmem>>, %arg5: memref<32x64xf32, #tpu.memory_space<vmem>>, %arg6: memref<32x64xf32, #tpu.memory_space<vmem>>, %arg7: memref<1x8x64xf32, #tpu.memory_space<vmem>>) attributes {dimension_semantics = [#tpu.dimension_semantics<parallel>], iteration_bounds = array<i64: 2>, scalar_prefetch = 0 : i64, scratch_operands = 0 : i64, tpu.core_type = #tpu.core_type<tc>, window_params = [{transform_indices = @transform_0, window_bounds = array<i64: 1, 8, 32>}, {transform_indices = @transform_1, window_bounds = array<i64: 1, 8, 32>}, {transform_indices = @transform_2, window_bounds = array<i64: 1, 8, 32>}, {pipeline_mode = #tpu.pipeline_mode<synchronous>, transform_indices = @transform_3, window_bounds = array<i64: 32, 64>}, {pipeline_mode = #tpu.pipeline_mode<synchronous>, transform_indices = @transform_4, window_bounds = array<i64: 32, 64>}, {pipeline_mode = #tpu.pipeline_mode<synchronous>, transform_indices = @transform_5, window_bounds = array<i64: 32, 64>}, {transform_indices = @transform_6, window_bounds = array<i64: 1, 8, 64>}]} {
    %c0 = arith.constant 0 : index
    %c0_0 = arith.constant 0 : index
    %c0_1 = arith.constant 0 : index
    %0 = vector.load %arg1[%c0, %c0_0, %c0_1] : memref<1x8x32xf32, #tpu.memory_space<vmem>>, vector<1x8x32xf32>
    %1 = vector.shape_cast %0 : vector<1x8x32xf32> to vector<8x32xf32>
    %c0_2 = arith.constant 0 : index
    %c0_3 = arith.constant 0 : index
    %c0_4 = arith.constant 0 : index
    %2 = vector.load %arg2[%c0_2, %c0_3, %c0_4] : memref<1x8x32xf32, #tpu.memory_space<vmem>>, vector<1x8x32xf32>
    %3 = vector.shape_cast %2 : vector<1x8x32xf32> to vector<8x32xf32>
    %c0_5 = arith.constant 0 : index
    %c0_6 = arith.constant 0 : index
    %c0_7 = arith.constant 0 : index
    %4 = vector.load %arg3[%c0_5, %c0_6, %c0_7] : memref<1x8x32xf32, #tpu.memory_space<vmem>>, vector<1x8x32xf32>
    %5 = vector.shape_cast %4 : vector<1x8x32xf32> to vector<8x32xf32>
    %c0_8 = arith.constant 0 : index
    %c0_9 = arith.constant 0 : index
    %6 = vector.load %arg4[%c0_8, %c0_9] : memref<32x64xf32, #tpu.memory_space<vmem>>, vector<32x64xf32>
    %cst = arith.constant dense<0.000000e+00> : vector<8x64xf32>
    %7 = tpu.matmul %1, %6, %cst {dimension_numbers = #tpu.dot_dimension_numbers<[1], [0], [0], [1], [0, 0, 1, 1], [], []>} : vector<8x32xf32>, vector<32x64xf32>, vector<8x64xf32> -> vector<8x64xf32>
    %c0_10 = arith.constant 0 : index
    %c0_11 = arith.constant 0 : index
    %8 = vector.load %arg5[%c0_10, %c0_11] : memref<32x64xf32, #tpu.memory_space<vmem>>, vector<32x64xf32>
    %cst_12 = arith.constant dense<0.000000e+00> : vector<8x64xf32>
    %9 = tpu.matmul %3, %8, %cst_12 {dimension_numbers = #tpu.dot_dimension_numbers<[1], [0], [0], [1], [0, 0, 1, 1], [], []>} : vector<8x32xf32>, vector<32x64xf32>, vector<8x64xf32> -> vector<8x64xf32>
    %c0_13 = arith.constant 0 : index
    %c0_14 = arith.constant 0 : index
    %10 = vector.load %arg6[%c0_13, %c0_14] : memref<32x64xf32, #tpu.memory_space<vmem>>, vector<32x64xf32>
    %cst_15 = arith.constant dense<0.000000e+00> : vector<8x64xf32>
    %11 = tpu.matmul %5, %10, %cst_15 {dimension_numbers = #tpu.dot_dimension_numbers<[1], [0], [0], [1], [0, 0, 1, 1], [], []>} : vector<8x32xf32>, vector<32x64xf32>, vector<8x64xf32> -> vector<8x64xf32>
    %12 = vector.extract_strided_slice %7 {offsets = [0, 0], sizes = [8, 16], strides = [1, 1]} : vector<8x64xf32> to vector<8x16xf32>
    %13 = vector.extract_strided_slice %9 {offsets = [0, 0], sizes = [8, 16], strides = [1, 1]} : vector<8x64xf32> to vector<8x16xf32>
    %14 = vector.extract_strided_slice %11 {offsets = [0, 0], sizes = [8, 16], strides = [1, 1]} : vector<8x64xf32> to vector<8x16xf32>
    %cst_16 = arith.constant dense<0.000000e+00> : vector<8x8xf32>
    %15 = tpu.matmul %12, %13, %cst_16 {dimension_numbers = #tpu.dot_dimension_numbers<[1], [1], [0], [0], [0, 0, 1, 0], [], []>} : vector<8x16xf32>, vector<8x16xf32>, vector<8x8xf32> -> vector<8x8xf32>
    %cst_17 = arith.constant dense<0xFF800000> : vector<8xf32>
    %16 = vector.multi_reduction <maximumf>, %15, %cst_17 [1] : vector<8x8xf32> to vector<8xf32>
    %17 = vector.shape_cast %16 : vector<8xf32> to vector<8x1xf32>
    %18 = vector.broadcast %17 : vector<8x1xf32> to vector<8x8xf32>
    %19 = arith.subf %15, %18 : vector<8x8xf32>
    %20 = math.exp %19 : vector<8x8xf32>
    %cst_18 = arith.constant dense<0.000000e+00> : vector<8xf32>
    %21 = vector.multi_reduction <add>, %20, %cst_18 [1] : vector<8x8xf32> to vector<8xf32>
    %22 = vector.shape_cast %21 : vector<8xf32> to vector<8x1xf32>
    %23 = tpu.reciprocal %22 {approx = true} : vector<8x1xf32> -> vector<8x1xf32>
    %24 = vector.broadcast %23 : vector<8x1xf32> to vector<8x8xf32>
    %25 = arith.mulf %20, %24 : vector<8x8xf32>
    %cst_19 = arith.constant dense<0.000000e+00> : vector<8x16xf32>
    %26 = tpu.matmul %25, %14, %cst_19 {dimension_numbers = #tpu.dot_dimension_numbers<[1], [0], [0], [1], [0, 0, 1, 1], [], []>} : vector<8x8xf32>, vector<8x16xf32>, vector<8x16xf32> -> vector<8x16xf32>
    %27 = vector.extract_strided_slice %7 {offsets = [0, 16], sizes = [8, 16], strides = [1, 1]} : vector<8x64xf32> to vector<8x16xf32>
    %28 = vector.extract_strided_slice %9 {offsets = [0, 16], sizes = [8, 16], strides = [1, 1]} : vector<8x64xf32> to vector<8x16xf32>
    %29 = vector.extract_strided_slice %11 {offsets = [0, 16], sizes = [8, 16], strides = [1, 1]} : vector<8x64xf32> to vector<8x16xf32>
    %cst_20 = arith.constant dense<0.000000e+00> : vector<8x8xf32>
    %30 = tpu.matmul %27, %28, %cst_20 {dimension_numbers = #tpu.dot_dimension_numbers<[1], [1], [0], [0], [0, 0, 1, 0], [], []>} : vector<8x16xf32>, vector<8x16xf32>, vector<8x8xf32> -> vector<8x8xf32>
    %cst_21 = arith.constant dense<0xFF800000> : vector<8xf32>
    %31 = vector.multi_reduction <maximumf>, %30, %cst_21 [1] : vector<8x8xf32> to vector<8xf32>
    %32 = vector.shape_cast %31 : vector<8xf32> to vector<8x1xf32>
    %33 = vector.broadcast %32 : vector<8x1xf32> to vector<8x8xf32>
    %34 = arith.subf %30, %33 : vector<8x8xf32>
    %35 = math.exp %34 : vector<8x8xf32>
    %cst_22 = arith.constant dense<0.000000e+00> : vector<8xf32>
    %36 = vector.multi_reduction <add>, %35, %cst_22 [1] : vector<8x8xf32> to vector<8xf32>
    %37 = vector.shape_cast %36 : vector<8xf32> to vector<8x1xf32>
    %38 = tpu.reciprocal %37 {approx = true} : vector<8x1xf32> -> vector<8x1xf32>
    %39 = vector.broadcast %38 : vector<8x1xf32> to vector<8x8xf32>
    %40 = arith.mulf %35, %39 : vector<8x8xf32>
    %cst_23 = arith.constant dense<0.000000e+00> : vector<8x16xf32>
    %41 = tpu.matmul %40, %29, %cst_23 {dimension_numbers = #tpu.dot_dimension_numbers<[1], [0], [0], [1], [0, 0, 1, 1], [], []>} : vector<8x8xf32>, vector<8x16xf32>, vector<8x16xf32> -> vector<8x16xf32>
    %42 = vector.extract_strided_slice %7 {offsets = [0, 32], sizes = [8, 16], strides = [1, 1]} : vector<8x64xf32> to vector<8x16xf32>
    %43 = vector.extract_strided_slice %9 {offsets = [0, 32], sizes = [8, 16], strides = [1, 1]} : vector<8x64xf32> to vector<8x16xf32>
    %44 = vector.extract_strided_slice %11 {offsets = [0, 32], sizes = [8, 16], strides = [1, 1]} : vector<8x64xf32> to vector<8x16xf32>
    %cst_24 = arith.constant dense<0.000000e+00> : vector<8x8xf32>
    %45 = tpu.matmul %42, %43, %cst_24 {dimension_numbers = #tpu.dot_dimension_numbers<[1], [1], [0], [0], [0, 0, 1, 0], [], []>} : vector<8x16xf32>, vector<8x16xf32>, vector<8x8xf32> -> vector<8x8xf32>
    %cst_25 = arith.constant dense<0xFF800000> : vector<8xf32>
    %46 = vector.multi_reduction <maximumf>, %45, %cst_25 [1] : vector<8x8xf32> to vector<8xf32>
    %47 = vector.shape_cast %46 : vector<8xf32> to vector<8x1xf32>
    %48 = vector.broadcast %47 : vector<8x1xf32> to vector<8x8xf32>
    %49 = arith.subf %45, %48 : vector<8x8xf32>
    %50 = math.exp %49 : vector<8x8xf32>
    %cst_26 = arith.constant dense<0.000000e+00> : vector<8xf32>
    %51 = vector.multi_reduction <add>, %50, %cst_26 [1] : vector<8x8xf32> to vector<8xf32>
    %52 = vector.shape_cast %51 : vector<8xf32> to vector<8x1xf32>
    %53 = tpu.reciprocal %52 {approx = true} : vector<8x1xf32> -> vector<8x1xf32>
    %54 = vector.broadcast %53 : vector<8x1xf32> to vector<8x8xf32>
    %55 = arith.mulf %50, %54 : vector<8x8xf32>
    %cst_27 = arith.constant dense<0.000000e+00> : vector<8x16xf32>
    %56 = tpu.matmul %55, %44, %cst_27 {dimension_numbers = #tpu.dot_dimension_numbers<[1], [0], [0], [1], [0, 0, 1, 1], [], []>} : vector<8x8xf32>, vector<8x16xf32>, vector<8x16xf32> -> vector<8x16xf32>
    %57 = vector.extract_strided_slice %7 {offsets = [0, 48], sizes = [8, 16], strides = [1, 1]} : vector<8x64xf32> to vector<8x16xf32>
    %58 = vector.extract_strided_slice %9 {offsets = [0, 48], sizes = [8, 16], strides = [1, 1]} : vector<8x64xf32> to vector<8x16xf32>
    %59 = vector.extract_strided_slice %11 {offsets = [0, 48], sizes = [8, 16], strides = [1, 1]} : vector<8x64xf32> to vector<8x16xf32>
    %cst_28 = arith.constant dense<0.000000e+00> : vector<8x8xf32>
    %60 = tpu.matmul %57, %58, %cst_28 {dimension_numbers = #tpu.dot_dimension_numbers<[1], [1], [0], [0], [0, 0, 1, 0], [], []>} : vector<8x16xf32>, vector<8x16xf32>, vector<8x8xf32> -> vector<8x8xf32>
    %cst_29 = arith.constant dense<0xFF800000> : vector<8xf32>
    %61 = vector.multi_reduction <maximumf>, %60, %cst_29 [1] : vector<8x8xf32> to vector<8xf32>
    %62 = vector.shape_cast %61 : vector<8xf32> to vector<8x1xf32>
    %63 = vector.broadcast %62 : vector<8x1xf32> to vector<8x8xf32>
    %64 = arith.subf %60, %63 : vector<8x8xf32>
    %65 = math.exp %64 : vector<8x8xf32>
    %cst_30 = arith.constant dense<0.000000e+00> : vector<8xf32>
    %66 = vector.multi_reduction <add>, %65, %cst_30 [1] : vector<8x8xf32> to vector<8xf32>
    %67 = vector.shape_cast %66 : vector<8xf32> to vector<8x1xf32>
    %68 = tpu.reciprocal %67 {approx = true} : vector<8x1xf32> -> vector<8x1xf32>
    %69 = vector.broadcast %68 : vector<8x1xf32> to vector<8x8xf32>
    %70 = arith.mulf %65, %69 : vector<8x8xf32>
    %cst_31 = arith.constant dense<0.000000e+00> : vector<8x16xf32>
    %71 = tpu.matmul %70, %59, %cst_31 {dimension_numbers = #tpu.dot_dimension_numbers<[1], [0], [0], [1], [0, 0, 1, 1], [], []>} : vector<8x8xf32>, vector<8x16xf32>, vector<8x16xf32> -> vector<8x16xf32>
    %72 = tpu.concatenate %26, %41, %56, %71 in 1 : vector<8x16xf32>, vector<8x16xf32>, vector<8x16xf32>, vector<8x16xf32> -> vector<8x64xf32>
    %c0_32 = arith.constant 0 : index
    %c0_33 = arith.constant 0 : index
    %c0_34 = arith.constant 0 : index
    %73 = vector.load %arg7[%c0_32, %c0_33, %c0_34] : memref<1x8x64xf32, #tpu.memory_space<vmem>>, vector<1x8x64xf32>
    %74 = vector.shape_cast %73 : vector<1x8x64xf32> to vector<8x64xf32>
    %75 = vector.shape_cast %72 : vector<8x64xf32> to vector<1x8x64xf32>
    tpu.vector_store %arg7[%c0_32, %c0_33, %c0_34], %75 {strides = array<i32>} : memref<1x8x64xf32, #tpu.memory_space<vmem>>, vector<1x8x64xf32>,
    return
  }
  func.func @transform_0(%arg0: i32) -> (i32, i32, i32) {
    %c0_i32 = arith.constant 0 : i32
    %c0_i32_0 = arith.constant 0 : i32
    %c0_i32_1 = arith.constant 0 : i32
    return %arg0, %c0_i32, %c0_i32_0 : i32, i32, i32
  }
  func.func @transform_1(%arg0: i32) -> (i32, i32, i32) {
    %c0_i32 = arith.constant 0 : i32
    %c0_i32_0 = arith.constant 0 : i32
    %c0_i32_1 = arith.constant 0 : i32
    return %arg0, %c0_i32, %c0_i32_0 : i32, i32, i32
  }
  func.func @transform_2(%arg0: i32) -> (i32, i32, i32) {
    %c0_i32 = arith.constant 0 : i32
    %c0_i32_0 = arith.constant 0 : i32
    %c0_i32_1 = arith.constant 0 : i32
    return %arg0, %c0_i32, %c0_i32_0 : i32, i32, i32
  }
  func.func @transform_3(%arg0: i32) -> (i32, i32) {
    %c0_i32 = arith.constant 0 : i32
    %c0_i32_0 = arith.constant 0 : i32
    %c0_i32_1 = arith.constant 0 : i32
    return %c0_i32, %c0_i32_0 : i32, i32
  }
  func.func @transform_4(%arg0: i32) -> (i32, i32) {
    %c0_i32 = arith.constant 0 : i32
    %c0_i32_0 = arith.constant 0 : i32
    %c0_i32_1 = arith.constant 0 : i32
    return %c0_i32, %c0_i32_0 : i32, i32
  }
  func.func @transform_5(%arg0: i32) -> (i32, i32) {
    %c0_i32 = arith.constant 0 : i32
    %c0_i32_0 = arith.constant 0 : i32
    %c0_i32_1 = arith.constant 0 : i32
    return %c0_i32, %c0_i32_0 : i32, i32
  }
  func.func @transform_6(%arg0: i32) -> (i32, i32, i32) {
    %c0_i32 = arith.constant 0 : i32
    %c0_i32_0 = arith.constant 0 : i32
    %c0_i32_1 = arith.constant 0 : i32
    return %arg0, %c0_i32, %c0_i32_0 : i32, i32, i32
  }
}

</mosaic_0001>

<bundles_post_ra>
// kernel: tpu_custom_call.1
= control target key start
LH: loop header
LB: loop body
LE: loop exit
PB: predicated region body
PF: predicated region fallthrough
CT: control target
= control target key end

     0   :  { %s2357_s0 = inlined_call_operand.hbm [shape: f32[2,8,32], index: 0, kind: input, shape index: {}]   ;;  %s2358_s1 = inlined_call_operand.hbm [shape: f32[2,8,32], index: 1, kind: input, shape index: {}]   ;;  %s2359_s2 = inlined_call_operand.hbm [shape: f32[2,8,32], index: 2, kind: input, shape index: {}]   ;;  %s2360_s3 = inlined_call_operand.hbm [shape: f32[32,64], index: 3, kind: input, shape index: {}]   ;;  %s2361_s4 = inlined_call_operand.hbm [shape: f32[32,64], index: 4, kind: input, shape index: {}]   ;;  %s2362_s5 = inlined_call_operand.hbm [shape: f32[32,64], index: 5, kind: input, shape index: {}]   ;;  %s2363_s6 = inlined_call_operand.hbm [shape: f32[2,8,64], index: 6, kind: output, shape index: {}]  }
   0x1   :  { %2380 = sst [smem:[#allocation23_spill]] %s2358_s1 }
   0x2   :  { %2381 = sst [smem:[#allocation24_spill]] %s2360_s3 }
   0x3   :  { %11 = vsyncpa [#allocation3], 0 }
   0x4   :  { %13 = vsyncpa [#allocation3 + $0x1], 0 }
   0x5   :  { %14 = vsyncpa [#allocation6], 0 }
   0x6   :  { %16 = vsyncpa [#allocation6 + $0x1], 0 }
   0x7   :  { %17 = vsyncpa [#allocation9], 0 }
   0x8   :  { %18 = vsyncpa [#allocation12], 0 }
   0x9   :  { %19 = vsyncpa [#allocation4], 0 }
   0xa   :  { %21 = vsyncpa [#allocation4 + $0x1], 0  ;;  %s1997_s21 = smov 0   ;;  %s1999_s22 = smov 0  }
   0xb   :  { %s2001_s23 = smov 0   ;;  %s2003_s24 = smov 0  }
   0xc LB: > { %2382 = sst [smem:[#allocation19_spill]] %s1943_s24  ;;  %s2018_s25 = sadd.s32 4294967295, %s1943_s24   ;;  %s1943_s24 = sphi %s2003_s24, %s2412_s24   ;;  %s1939_s23 = sphi %s2001_s23, %s2416_s23   ;;  %s1935_s22 = sphi %s1999_s22, %s2415_s22   ;;  %s1931_s21 = sphi %s1997_s21, %s2414_s21  }
   0xd   : > { %s1449_s26 = sadd.s32 4294967294, %s1943_s24   ;;  %p47_p0 = scmp.ne.s32.totalorder %s1935_s22, %s1931_s21 }
   0xe   : > { %p2369_p1 = scmp.eq.s32.totalorder %s2018_s25, 0  ;;  %p186_p2 = scmp.eq.s32.totalorder %s2018_s25, 1 }
   0xf   : > { %p192_p3 = scmp.eq.s32.totalorder %s1449_s26, 1  ;;  %p1450_p5 = scmp.ge.s32.totalorder %s1943_s24, 1 }
  0x10   : > { %p2027_p4 = por %p2369_p1, %p47_p0  ;;  %p199_p7 = scmp.lt.s32.totalorder %s1943_s24, 3 }
  0x11   : > { %p2032_p6 = por %p192_p3, %p47_p0  ;;  %s1945_s30 = smov [#allocation8]  }
  0x12   : > { %s2383_s27 = scalar_select %p2027_p4, 1, 0 }
  0x13   : > { %s2384_s28 = scalar_select %p2032_p6, 1, 0 }
  0x14   : > { %p2037_p8 = pnand %p1450_p5, %p199_p7  ;;  %s211_s7 = sshll.u32 %s1945_s30, 4  ;;  %s212_s7 = int_to_ptr.vmem [resolvable:$true] %s211_s7 }
  0x15   : > { %2385 = sst [smem:[#allocation20_spill]] %s2384_s28  ;;  %s2051_s9 = sadd.s32 1, %s1943_s24  }
  0x16   : > { %s2386_s29 = scalar_select %p2037_p8, 1, 0 }
  0x17   : > { %p1612_p9 = pneg %p2037_p8  ;;  %2388 = sst [smem:[#allocation21_spill]] %s2051_s9 }
  0x18   : > { %s34_s10 = sadd.s32 1, %s1939_s23  ;;  %s31_s11 = ssub.s32 %s1943_s24, %s2051_s9 }
  0x19   : > { %p2046_p11 = pnand %p1612_p9, %p2369_p1  ;;  %s1716_s12 = scalar_lea.vmem %s212_s7, 512 }
  0x1a   : > { %p1717_p13 = scmp.ne.s32.totalorder %s212_s7, %s1716_s12  ;;  %p1724_p5 = scmp.lt.s32.totalorder %s212_s7, %s212_s7 }
  0x1b   : > { %s2387_s8 = scalar_select %p2046_p11, 1, 0 }
  0x1c   : > { %p2370_p12 = pneg %p2046_p11  ;;  %p1725_p7 = scmp.lt.s32.totalorder %s1716_s12, %s1716_s12 }
  0x1e   : > { %p1719_p0 = pnand %p1717_p13, %p2370_p12  ;;  %p1726_p9 = por %p1725_p7, %p1724_p5 }
  0x20   : > { %p1720_p3 = pneg %p1719_p0 }
  0x22   : > { %p1727_p10 = pnand %p1726_p9, %p1720_p3 }
  0x24   : > { %1730 = shalt.err (!%p1727_p10)
}
  0x25   : > { %s2365_s13 = smov 128   ;;  %s2367_s14 = smov 8  }
  0x26   : > { %s2389_s3 = sld [smem:[#allocation24_spill]]  ;;  %p32_p10 = scmp.eq.s32.totalorder %s31_s11, 0 }
  0x27   : > { %p41_p13 = scmp.ne.s32.totalorder %s1939_s23, %s1935_s22  ;;  %p42_p0 = scmp.eq.s32.totalorder %s1943_s24, 0 }
  0x28   : > { %p1639_p3 = scmp.lt.s32.totalorder %s1943_s24, 2  ;;  %s2364_s19 = sand.u32 1, %s1939_s23  }
  0x29   : > { %s2074_s17 = scalar_select %p32_p10, %s1939_s23, %s34_s10  }
  0x2a   : > { %p43_p5 = por %p42_p0, %p41_p13  ;;  %p2078_p7 = por %p186_p2, %p41_p13 }
  0x2b   : > { %2390 = sst [smem:[#allocation22_spill]] %s2074_s17  ;;  %s2084_s20 = sshll.u32 %s1943_s24, 7 }
  0x2c   : > { %1615 = dma.hbm_to_vmem [thread:$0]  (!%p2046_p11), %s2389_s3, 512, %s212_s7, [#allocation9], %s2365_s13, %s2365_s13, %s2367_s14  }
  0x2d   : > { %s2391_s18 = scalar_select %p2078_p7, 1, 0 }
  0x2e   : > { %s2088_s26 = sshll.u32 %s2364_s19, 3  ;;  %p2090_p9 = pnand %p1639_p3, %p43_p5 }
  0x2f   : > { %s269_s7 = sand.u32 1, %s1943_s24   ;;  %s2393_s1 = sld [smem:[#allocation23_spill]] }
  0x30   : > { %s273_s15 = scalar_lea.vmem [#allocation5], %s2088_s26  ;;  %s2102_s19 = scalar_lea.sflag [#allocation6], %s269_s7 }
  0x31   : > { %s280_s16 = sshll.u32 %s273_s15, 4  ;;  %p2108_p10 = pneg %p2090_p9  ;;  %s281_s16 = int_to_ptr.vmem [resolvable:$true] %s280_s16 }
  0x35   : > { %s2099_s12 = scalar_lea.hbm %s2393_s1, %s2084_s20  ;;  %s1736_s3 = scalar_lea.hbm %s2393_s1, 256 }
  0x36   : > { %s1731_s13 = scalar_lea.hbm %s2099_s12, 128  ;;  %p1737_p3 = scmp.lt.s32.totalorder %s2099_s12, %s2393_s1 }
  0x37   : > { %p1732_p2 = scmp.ne.s32.totalorder %s2099_s12, %s1731_s13  ;;  %p1738_p5 = scmp.lt.s32.totalorder %s1736_s3, %s1731_s13 }
  0x39   : > { %p1734_p13 = pnand %p2108_p10, %p1732_p2  ;;  %p1739_p1 = por %p1738_p5, %p1737_p3 }
  0x3b   : > { %p1735_p0 = pneg %p1734_p13 }
  0x3d   : > { %p1740_p12 = pnand %p1739_p1, %p1735_p0 }
  0x3f   : > { %1743 = shalt.err (!%p1740_p12)
}
  0x40   : > { %s1744_s7 = scalar_lea.vmem %s281_s16, 128  ;;  %s1948_s9 = smov [#allocation5]  }
  0x41   : > { %p1745_p6 = scmp.ne.s32.totalorder %s281_s16, %s1744_s7  ;;  %s1749_s24 = sshll.u32 %s1948_s9, 4  ;;  %s1750_s24 = int_to_ptr.vmem [resolvable:$false] %s1749_s24 }
  0x42   : > { %s1751_s28 = scalar_lea.vmem %s1750_s24, 256  ;;  %p1752_p2 = scmp.lt.s32.totalorder %s281_s16, %s1750_s24 }
  0x43   : > { %p1747_p7 = pnand %p1745_p6, %p2108_p10  ;;  %p1753_p13 = scmp.lt.s32.totalorder %s1751_s28, %s1744_s7 }
  0x45   : > { %p1748_p4 = pneg %p1747_p7  ;;  %p1754_p8 = por %p1753_p13, %p1752_p2 }
  0x47   : > { %p1755_p11 = pnand %p1754_p8, %p1748_p4 }
  0x49   : > { %1758 = shalt.err (!%p1755_p11)
}
  0x4a   : > { %1628 = dma.hbm_to_vmem [thread:$0]  (!%p2090_p9), %s2099_s12, 128, %s281_s16, %s2102_s19  }
  0x4b   : > { %s1949_s3 = smov [#allocation10]   ;;  %s1950_s17 = smov [#allocation11]  }
  0x4c   : > { %s224_s13 = sshll.u32 %s1949_s3, 4  ;;  %s237_s10 = sshll.u32 %s1950_s17, 4  ;;  %s225_s13 = int_to_ptr.vmem [resolvable:$true] %s224_s13  ;;  %s238_s10 = int_to_ptr.vmem [resolvable:$true] %s237_s10 }
  0x4d   : > { %s1770_s11 = scalar_lea.vmem %s225_s13, 512  ;;  %p2395_p6 = scmp.ne.s32.totalorder %s2387_s8, 0 }
  0x4e   : > { %p1771_p1 = scmp.ne.s32.totalorder %s225_s13, %s1770_s11  ;;  %p1778_p3 = scmp.lt.s32.totalorder %s225_s13, %s225_s13 }
  0x4f   : > { %p2396_p12 = pneg %p2395_p6  ;;  %p1779_p4 = scmp.lt.s32.totalorder %s1770_s11, %s1770_s11 }
  0x51   : > { %p1773_p7 = pnand %p1771_p1, %p2396_p12  ;;  %p1780_p8 = por %p1779_p4, %p1778_p3 }
  0x53   : > { %p1774_p0 = pneg %p1773_p7 }
  0x55   : > { %p1781_p11 = pnand %p1780_p8, %p1774_p0 }
  0x57   : > { %1784 = shalt.err (!%p1781_p11)
}
  0x58   : > { %s2397_s24 = smov 8   ;;  %s2398_s28 = smov 128  }
  0x59   : > { %1618 = dma.hbm_to_vmem [thread:$0]  (!%p2395_p6), %s2361_s4, 512, %s225_s13, [#allocation9], %s2398_s28, %s2398_s28, %s2397_s24  }
  0x5a   : > { %s1796_s16 = scalar_lea.vmem %s238_s10, 512  ;;  %p2399_p2 = pmov %p2396_p12 }
  0x5b   : > { %p1797_p5 = scmp.ne.s32.totalorder %s238_s10, %s1796_s16  ;;  %p1804_p12 = scmp.lt.s32.totalorder %s238_s10, %s238_s10 }
  0x5c   : > { %p1805_p7 = scmp.lt.s32.totalorder %s1796_s16, %s1796_s16 }
  0x5d   : > { %p1799_p13 = pnand %p1797_p5, %p2399_p2 }
  0x5e   : > { %p1806_p0 = por %p1805_p7, %p1804_p12 }
  0x5f   : > { %p1800_p1 = pneg %p1799_p13 }
  0x61   : > { %p1807_p3 = pnand %p1806_p0, %p1800_p1 }
  0x63   : > { %1810 = shalt.err (!%p1807_p3)
}
  0x64   : > { %1621 = dma.hbm_to_vmem [thread:$0]  (!%p2395_p6), %s2362_s5, 512, %s238_s10, [#allocation12], %s2398_s28, %s2398_s28, %s2397_s24  }
  0x65   : > { %s2153_s17 = scalar_lea.hbm %s2357_s0, %s2084_s20  ;;  %s255_s8 = scalar_lea.vmem [#allocation2], %s2088_s26 }
  0x66   : > { %s262_s11 = sshll.u32 %s255_s8, 4  ;;  %s2160_s16 = scalar_lea.hbm %s2359_s2, %s2084_s20  ;;  %s263_s11 = int_to_ptr.vmem [resolvable:$true] %s262_s11 }
  0x67   : > { %s2400_s15 = sand.u32 1, %s1939_s23   ;;  %s1811_s1 = scalar_lea.hbm %s2153_s17, 128 }
  0x68   : > { %s252_s7 = scalar_lea.sflag [#allocation3], %s2400_s15  ;;  %p1812_p6 = scmp.ne.s32.totalorder %s2153_s17, %s1811_s1 }
  0x69   : > { %s1816_s28 = scalar_lea.hbm %s2357_s0, 256  ;;  %p1817_p11 = scmp.lt.s32.totalorder %s2153_s17, %s2357_s0 }
  0x6a   : > { %p1814_p4 = pnand %p1812_p6, %p2108_p10  ;;  %p1818_p5 = scmp.lt.s32.totalorder %s1816_s28, %s1811_s1 }
  0x6c   : > { %p1815_p8 = pneg %p1814_p4  ;;  %p1819_p2 = por %p1818_p5, %p1817_p11 }
  0x6e   : > { %p1820_p13 = pnand %p1819_p2, %p1815_p8 }
  0x70   : > { %1823 = shalt.err (!%p1820_p13)
}
  0x71   : > { %s1824_s20 = scalar_lea.vmem %s263_s11, 128  ;;  %s1951_s8 = smov [#allocation2]  }
  0x72   : > { %p1825_p1 = scmp.ne.s32.totalorder %s263_s11, %s1824_s20  ;;  %s1829_s9 = sshll.u32 %s1951_s8, 4  ;;  %s1830_s9 = int_to_ptr.vmem [resolvable:$false] %s1829_s9 }
  0x73   : > { %s1831_s12 = scalar_lea.vmem %s1830_s9, 256  ;;  %p1832_p0 = scmp.lt.s32.totalorder %s263_s11, %s1830_s9 }
  0x74   : > { %p1827_p12 = pnand %p1825_p1, %p2108_p10  ;;  %p1833_p3 = scmp.lt.s32.totalorder %s1831_s12, %s1824_s20 }
  0x76   : > { %p1828_p7 = pneg %p1827_p12  ;;  %p1834_p6 = por %p1833_p3, %p1832_p0 }
  0x78   : > { %p1835_p4 = pnand %p1834_p6, %p1828_p7 }
  0x7a   : > { %1838 = shalt.err (!%p1835_p4)
}
  0x7b   : > { %1625 = dma.hbm_to_vmem [thread:$0]  (!%p2090_p9), %s2153_s17, 128, %s263_s11, %s252_s7  }
  0x7c   : > { %s291_s1 = scalar_lea.vmem [#allocation7], %s2088_s26  ;;  %s1839_s10 = scalar_lea.hbm %s2160_s16, 128 }
  0x7d   : > { %s298_s15 = sshll.u32 %s291_s1, 4  ;;  %p1840_p8 = scmp.ne.s32.totalorder %s2160_s16, %s1839_s10  ;;  %s299_s15 = int_to_ptr.vmem [resolvable:$true] %s298_s15 }
  0x7e   : > { %s1844_s3 = scalar_lea.hbm %s2359_s2, 256  ;;  %p1845_p2 = scmp.lt.s32.totalorder %s2160_s16, %s2359_s2 }
  0x7f   : > { %p1842_p11 = pnand %p1840_p8, %p2108_p10  ;;  %p1846_p13 = scmp.lt.s32.totalorder %s1844_s3, %s1839_s10 }
  0x81   : > { %p1843_p5 = pneg %p1842_p11  ;;  %p1847_p1 = por %p1846_p13, %p1845_p2 }
  0x83   : > { %p1848_p12 = pnand %p1847_p1, %p1843_p5 }
  0x85   : > { %1851 = shalt.err (!%p1848_p12)
}
  0x86   : > { %s1852_s26 = scalar_lea.vmem %s299_s15, 128  ;;  %s1952_s17 = smov [#allocation7]  }
  0x87   : > { %p1853_p7 = scmp.ne.s32.totalorder %s299_s15, %s1852_s26  ;;  %s1857_s11 = sshll.u32 %s1952_s17, 4  ;;  %s1858_s11 = int_to_ptr.vmem [resolvable:$false] %s1857_s11 }
  0x88   : > { %s1859_s7 = scalar_lea.vmem %s1858_s11, 256  ;;  %p1860_p6 = scmp.lt.s32.totalorder %s299_s15, %s1858_s11 }
  0x89   : > { %p1855_p0 = pnand %p1853_p7, %p2108_p10  ;;  %p1861_p4 = scmp.lt.s32.totalorder %s1859_s7, %s1852_s26 }
  0x8b   : > { %p1856_p3 = pneg %p1855_p0  ;;  %p1862_p8 = por %p1861_p4, %p1860_p6 }
  0x8d   : > { %p1863_p11 = pnand %p1862_p8, %p1856_p3 }
  0x8f   : > { %1866 = shalt.err (!%p1863_p11)
}
  0x90   : > { %1631 = dma.hbm_to_vmem [thread:$0]  (!%p2090_p9), %s2160_s16, 128, %s299_s15, %s2102_s19  }
  0x91   : > { %p2401_p5 = scmp.ne.s32.totalorder %s2386_s29, 0 }
  0x92   : > { %s2201_s14 = sand.u32 (!%p2401_p5), 1, %s1935_s22   ;;  %p2402_p10 = scmp.ne.s32.totalorder (!%p2401_p5), %s2383_s27, 0 }
  0x93   : > { %307 = sbr.rel (%p2401_p5) target bundleno = 1321 (0x529), region = 44  ;;  %s2204_s8 = sshll.u32 (!%p2401_p5), %s2201_s14, 3 }
  0x94   : > { %s310_s9 = scalar_lea.sflag (!%p2401_p5), [#allocation3], %s2201_s14  ;;  %s313_s12 = scalar_lea.vmem (!%p2401_p5), [#allocation2], %s2204_s8 }
  0x98   : > { %1910 = dma.done.wait (%p2402_p10), %s310_s9, 128  }
  0x99   : > { %1912 = vsyncadd (%p2402_p10), %s310_s9, 4294967168  ;;  %s318_s29 = sand.u32 1, %s2018_s25   ;;  %s322_s30 = scalar_lea.vmem [#allocation5], %s2204_s8 }
  0x9a   : > { %s319_s19 = scalar_lea.sflag [#allocation6], %s318_s29 }
  0x9b   : > { %1914 = dma.done.wait (%p2402_p10), %s319_s19, 256  }
  0x9c   : > { %1916 = vsyncadd (%p2402_p10), %s319_s19, 4294967040  ;;  %s331_s16 = scalar_lea.vmem [#allocation7], %s2204_s8  ;;  %p2403_p9 = scmp.eq.s32.totalorder %s2018_s25, 0 }
  0x9e   : > { %1918 = dma.done.wait (%p2403_p9), [#allocation9], 1024   ;;  %p2404_p2 = pmov %p2403_p9 }
  0xa0   : > { %1920 = vsyncadd (%p2404_p2), [#allocation9], 4294966272  ;;  %p2405_p13 = pmov %p2404_p2 }
  0xa1   : > { %p2406_p1 = pmov %p2404_p2 }
  0xa2   : > { %1922 = dma.done.wait (%p2405_p13), [#allocation12], 512  }
  0xa3   : > { %1924 = vsyncadd (%p2406_p1), [#allocation12], 4294966784  ;;  %v1953_v0 = vmov 0.0   ;;  %vm1954_vm0 = vmmov 0   ;;  %v466_v1 = vld [vmem:[#allocation10 + $0x18] sm:$0xff]  ;;  %v465_v3 = vld [vmem:[#allocation10 + $0x10] sm:$0xff] }
  0xa4   : > { %1530 = vmatprep.subr.mxu1 %v1953_v0  ;;  %1519 = vmatprep.subr.mxu0 %v1953_v0  ;;  %v388_v2 = vld [vmem:[#allocation8 + $0x18] sm:$0xff]  ;;  %v387_v4 = vld [vmem:[#allocation8 + $0x10] sm:$0xff]  ;;  %v464_v5 = vld [vmem:[#allocation10 + $0x8] sm:$0xff]  ;;  %vm389_vm1 = vcmask 261120   ;;  %vm617_vm2 = vcmask 130048   ;;  %s1955_s27 = smov 96  }
  0xa5   : > { %1538 = vmatprep.mubr.msk.f32.mxu1 %vm1954_vm0, %v1953_v0  ;;  %1527 = vmatprep.mubr.msk.f32.mxu0 %vm1954_vm0, %v1953_v0  ;;  %v386_v6 = vld [vmem:[#allocation8 + $0x8] sm:$0xff]  ;;  %v463_v7 = vld [vmem:[#allocation10] sm:$0xff]  ;;  %v382_v10 = vld [vmem:[%s313_s12] sm:$0xff]  ;;  %s1956_s1 = smov 112   ;;  %s1957_s15 = smov 80   ;;  %vm694_vm3 = vcmask 64512  }
  0xa6   : > { %1531 = vmatpush3.msra.mxu1 %v466_v1  ;;  %1520 = vmatpush3.msra.mxu0 %v388_v2  ;;  %v385_v8 = vld [vmem:[#allocation8] sm:$0xff]  ;;  %v543_v11 = vld [vmem:[#allocation11 + $0x18] sm:$0xff]  ;;  %v542_v12 = vld [vmem:[#allocation11 + $0x10] sm:$0xff]  ;;  %s1958_s10 = smov 16   ;;  %s1959_s24 = smov 32   ;;  %vm1289_vm4 = vcmask 392192  }
  0xa7   : > { %1532 = vmatprep.subr.mxu1 %v1953_v0  ;;  %1521 = vmatprep.subr.mxu0 %v1953_v0  ;;  %v383_v9 = vld [vmem:[%s322_s30] sm:$0xff]  ;;  %v384_v15 = vld [vmem:[%s331_s16] sm:$0xff]  ;;  %s1960_s28 = smov 48   ;;  %s1485_s3 = sshll.u32 %s2018_s25, 7  ;;  %vm1291_vm5 = vcmask 523264  }
  0xa8   : > { %1533 = vmatpush3.msra.mxu1 %v465_v3  ;;  %1522 = vmatpush3.msra.mxu0 %v387_v4  ;;  %v541_v13 = vld [vmem:[#allocation11 + $0x8] sm:$0xff]  ;;  %v540_v14 = vld [vmem:[#allocation11] sm:$0xff]  ;;  %s381_s13 = scalar_lea.vmem [#allocation13], %s2204_s8  ;;  %s2320_s11 = scalar_lea.hbm %s2363_s6, %s1485_s3 }
  0xa9   : > { %1534 = vmatprep.subr.mxu1 %v1953_v0  ;;  %1523 = vmatprep.subr.mxu0 %v1953_v0  ;;  %s1307_s20 = sshll.u32 %s381_s13, 4  ;;  %s1294_s7 = scalar_lea.sflag [#allocation4], %s2201_s14  ;;  %s1308_s20 = int_to_ptr.vmem [resolvable:$true] %s1307_s20 }
  0xaa   : > { %1535 = vmatpush3.msra.mxu1 %v464_v5  ;;  %1524 = vmatpush3.msra.mxu0 %v386_v6  ;;  %s1867_s9 = scalar_lea.vmem %s1308_s20, 128  ;;  %p2407_p7 = scmp.ne.s32.totalorder %s2391_s18, 0 }
  0xab   : > { %1536 = vmatprep.subr.mxu1 %v1953_v0  ;;  %1525 = vmatprep.subr.mxu0 %v1953_v0  ;;  %p1868_p12 = scmp.ne.s32.totalorder %s1308_s20, %s1867_s9  ;;  %s1961_s25 = smov [#allocation13]  }
  0xac   : > { %1537 = vmatpush3.msra.mxu1 %v463_v7  ;;  %1526 = vmatpush3.msra.mxu0 %v385_v8  ;;  %s1871_s8 = sshll.u32 %s1961_s25, 4  ;;  %s1872_s8 = int_to_ptr.vmem [resolvable:$false] %s1871_s8 }
  0xad   : > { %1539 = vmatmul.mubr.msk.f32.vlgmr.msra.gmra.mxu1 %vm389_vm1, %v383_v9  ;;  %1528 = vmatmul.mubr.msk.f32.vlgmr.msra.gmra.mxu0 %vm389_vm1, %v382_v10  ;;  %p1869_p0 = pnand %p1868_p12, %p2407_p7  ;;  %s1873_s12 = scalar_lea.vmem %s1872_s8, 256 }
  0xae   : > { %1552 = vmatprep.subr.mxu1 %v1953_v0  ;;  %1554 = vmatprep.mubr.msk.f32.mxu1 %vm1954_vm0, %v1953_v0  ;;  %p1874_p6 = scmp.lt.s32.totalorder %s1308_s20, %s1872_s8  ;;  %p1875_p4 = scmp.lt.s32.totalorder %s1873_s12, %s1867_s9 }
  0xaf   : > { %1541 = vmatprep.subr.mxu0 %v1953_v0  ;;  %1549 = vmatprep.mubr.msk.f32.mxu0 %vm1954_vm0, %v1953_v0  ;;  %p1870_p3 = pneg %p1869_p0 }
  0xb0   : > { %1542 = vmatpush3.msra.mxu0 %v543_v11  ;;  %p1876_p8 = por %p1875_p4, %p1874_p6 }
  0xb1   : > { %1543 = vmatprep.subr.mxu0 %v1953_v0 }
  0xb2   : > { %1544 = vmatpush3.msra.mxu0 %v542_v12  ;;  %p1877_p11 = pnand %p1876_p8, %p1870_p3 }
  0xb3   : > { %1545 = vmatprep.subr.mxu0 %v1953_v0 }
  0xb4   : > { %1546 = vmatpush3.msra.mxu0 %v541_v13 }
  0xb5   : > { %1547 = vmatprep.subr.mxu0 %v1953_v0 }
  0xb6   : > { %1548 = vmatpush3.msra.mxu0 %v540_v14 }
  0xb7   : > { %1550 = vmatmul.mubr.msk.f32.vlgmr.msra.gmra.mxu0 %vm389_vm1, %v384_v15  ;;  %1562 = vmatprep.subr.mxu0 %v1953_v0 }
  0xb8   : > { %1564 = vmatprep.mubr.msk.f32.mxu0 %vm1954_vm0, %v1953_v0 }
 0x16d   : > { %v536_v16 = vpop.f32.mrf.mxu1  ;;  %v459_v17 = vpop.f32.mrf.mxu0 }
 0x16e   : > { %947 = vrot.lane.b32.xlu1 %v536_v16, %s1955_s27  ;;  %781 = vrot.lane.b32.xlu0 %v536_v16, %s1956_s1 }
 0x16f   : > { %1553 = vmatpush3.xpose.msk.msra.mxu1 %vm617_vm2, %v536_v16  ;;  %v1540_v18 = vpop.f32.mrf.mxu1  ;;  %v1529_v19 = vpop.f32.mrf.mxu0 }
 0x170   : > { %1557 = vmatprep.subr.mxu1 %v1953_v0 }
 0x172   : > { %1555 = vmatmul.mubr.msk.f32.vlgmr.msra.gmra.mxu1 %vm617_vm2, %v459_v17  ;;  %945 = vrot.lane.b32.xlu1 %v459_v17, %s1955_s27 }
 0x173   : > { %779 = vrot.lane.b32.xlu0 %v459_v17, %s1956_s1  ;;  %1559 = vmatprep.mubr.msk.f32.mxu1 %vm1954_vm0, %v1953_v0 }
 0x176   : > { %1110 = vrot.lane.b32.xlu1 %v459_v17, %s1957_s15 }
 0x177   : > { %1112 = vrot.lane.b32.xlu0 %v536_v16, %s1957_s15  ;;  %v2271_v20 = vpop.f32.mrf.mxu0 }
 0x178   : > { %1558 = vmatpush3.msra.mxu1 %v2271_v20 }
 0x179   : > { %v1551_v21 = vpop.f32.mrf.mxu0  ;;  %1567 = vmatprep.subr.mxu1 %v1953_v0 }
 0x1e0   : > { %v782_v22 = vpop.permute.xlu0 %781  ;;  %v948_v23 = vpop.permute.xlu1 %947 }
 0x1e1   : > { %1563 = vmatpush3.xpose.msk.msra.mxu0 %vm617_vm2, %v782_v22 }
 0x1e2   : > { %1572 = vmatprep.subr.mxu0 %v1953_v0 }
 0x1e4   : > { %v946_v25 = vpop.permute.xlu1 %945 }
 0x1e5   : > { %v780_v24 = vpop.permute.xlu0 %779 }
 0x1e6   : > { %1565 = vmatmul.mubr.msk.f32.vlgmr.msra.gmra.mxu0 %vm617_vm2, %v780_v24 }
 0x1e7   : > { %1573 = vmatpush3.xpose.msk.msra.mxu0 %vm617_vm2, %v948_v23  ;;  %1574 = vmatprep.mubr.msk.f32.mxu0 %vm1954_vm0, %v1953_v0 }
 0x1e8   : > { %1582 = vmatprep.subr.mxu0 %v1953_v0  ;;  %v1111_v27 = vpop.permute.xlu1 %1110 }
 0x1e9   : > { %v1113_v26 = vpop.permute.xlu0 %1112 }
 0x1ea   : > { %1575 = vmatmul.mubr.msk.f32.vlgmr.msra.gmra.mxu0 %vm617_vm2, %v946_v25 }
 0x1eb   : > { %1583 = vmatpush3.xpose.msk.msra.mxu0 %vm617_vm2, %v1113_v26  ;;  %1584 = vmatprep.mubr.msk.f32.mxu0 %vm1954_vm0, %v1953_v0 }
 0x1ee   : > { %1585 = vmatmul.mubr.msk.f32.vlgmr.msra.gmra.mxu0 %vm617_vm2, %v1111_v27 }
 0x232   : > { %v690_v28 = vpop.f32.mrf.mxu1 }
 0x233   : > { %v695_v29 = vsel %vm694_vm3, %v690_v28, -inf }
 0x234   : > { %696 = vmax.xlane.f32.xlu0 %v695_v29  ;;  %v1556_v30 = vpop.f32.mrf.mxu1 }
 0x2a6   : > { %v853_v31 = vpop.f32.mrf.mxu0 }
 0x2a7   : > { %v857_v32 = vsel %vm694_vm3, %v853_v31, -inf }
 0x2a8   : > { %858 = vmax.xlane.f32.xlu1 %v857_v32  ;;  %v1566_v33 = vpop.f32.mrf.mxu0 }
 0x2aa   : > { %v1019_v34 = vpop.f32.mrf.mxu0 }
 0x2ab   : > { %v1023_v35 = vsel %vm694_vm3, %v1019_v34, -inf }
 0x2ac   : > { %1024 = vmax.xlane.f32.xlu0 %v1023_v35  ;;  %v1576_v36 = vpop.f32.mrf.mxu0 }
 0x2ae   : > { %v1184_v37 = vpop.f32.mrf.mxu0 }
 0x2af   : > { %v1188_v38 = vsel %vm694_vm3, %v1184_v37, -inf }
 0x2b0   : > { %1189 = vmax.xlane.f32.xlu0 %v1188_v38  ;;  %v1586_v39 = vpop.f32.mrf.mxu0 }
 0x2b9   : > { %869 = vrot.lane.b32.xlu1 %v2271_v20, %s1956_s1 }
 0x2bd   : > { %v697_v40 = vpop.xlane.xlu0 %696 }
 0x2be   : > { %v698_v41 = vsub.f32 %v690_v28, %v697_v40 }
 0x2c0   : > { %v699_v42 = vmul.f32 1.442695, %v698_v41 }
 0x2c2   : > { %1689 = vpow2.f32 %v699_v42 }
 0x2cf   : > { %v1690_v43 = vpop.eup %1689 }
 0x2d0   : > { %v701_v44 = vsel %vm694_vm3, %v1690_v43, 0.0 }
 0x2dd   : > { %702 = vadd.xlane.f32.xlu1 %v701_v44 }
 0x331   : > { %v859_v45 = vpop.xlane.xlu1 %858 }
 0x332   : > { %v860_v46 = vsub.f32 %v853_v31, %v859_v45 }
 0x334   : > { %v861_v47 = vmul.f32 1.442695, %v860_v46 }
 0x335   : > { %v1025_v48 = vpop.xlane.xlu0 %1024  ;;  %v870_v60 = vpop.permute.xlu1 %869 }
 0x336   : > { %1691 = vpow2.f32 %v861_v47  ;;  %v1026_v49 = vsub.f32 %v1019_v34, %v1025_v48 }
 0x338   : > { %v1027_v50 = vmul.f32 1.442695, %v1026_v49 }
 0x339   : > { %v1190_v51 = vpop.xlane.xlu0 %1189 }
 0x33a   : > { %1693 = vpow2.f32 %v1027_v50  ;;  %v1191_v52 = vsub.f32 %v1184_v37, %v1190_v51 }
 0x33c   : > { %v1192_v53 = vmul.f32 1.442695, %v1191_v52 }
 0x33e   : > { %1695 = vpow2.f32 %v1192_v53 }
 0x343   : > { %v1692_v54 = vpop.eup %1691 }
 0x344   : > { %v863_v55 = vsel %vm694_vm3, %v1692_v54, 0.0 }
 0x345   : > { %864 = vadd.xlane.f32.xlu0 %v863_v55 }
 0x347   : > { %v1694_v56 = vpop.eup %1693 }
 0x348   : > { %v1029_v57 = vsel %vm694_vm3, %v1694_v56, 0.0 }
 0x349   : > { %1030 = vadd.xlane.f32.xlu1 %v1029_v57 }
 0x34b   : > { %v1696_v58 = vpop.eup %1695 }
 0x34c   : > { %v1194_v59 = vsel %vm694_vm3, %v1696_v58, 0.0 }
 0x34d   : > { %1195 = vadd.xlane.f32.xlu0 %v1194_v59 }
 0x35a   : > { %1199 = vrot.lane.b32.xlu1 %v2271_v20, %s1957_s15 }
 0x363   : > { %1034 = vrot.lane.b32.xlu0 %v2271_v20, %s1955_s27 }
 0x366   : > { %v703_v61 = vpop.xlane.xlu1 %702 }
 0x367   : > { %1697 = vrcp.f32 %v703_v61 }
 0x374   : > { %v1698_v62 = vpop.eup %1697 }
 0x375   : > { %v705_v63 = vmul.f32 %v1698_v62, %v1690_v43 }
 0x377   : > { %1560 = vmatmul.mubr.msk.f32.vlgmr.msra.gmra.mxu1 %vm694_vm3, %v705_v63 }
 0x378   : > { %1568 = vmatpush3.msra.mxu1 %v870_v60  ;;  %1569 = vmatprep.mubr.msk.f32.mxu1 %vm1954_vm0, %v1953_v0 }
 0x379   : > { %1577 = vmatprep.subr.mxu1 %v1953_v0 }
 0x3ce   : > { %v865_v1 = vpop.xlane.xlu0 %864 }
 0x3cf   : > { %1699 = vrcp.f32 %v865_v1 }
 0x3d2   : > { %v1031_v2 = vpop.xlane.xlu1 %1030 }
 0x3d3   : > { %1701 = vrcp.f32 %v1031_v2 }
 0x3d6   : > { %v1196_v3 = vpop.xlane.xlu0 %1195  ;;  %v1200_v9 = vpop.permute.xlu1 %1199 }
 0x3d7   : > { %1703 = vrcp.f32 %v1196_v3 }
 0x3da   : > { %v1035_v6 = vpop.permute.xlu0 %1034 }
 0x3dc   : > { %v1700_v4 = vpop.eup %1699 }
 0x3dd   : > { %v867_v5 = vmul.f32 %v1700_v4, %v1692_v54 }
 0x3df   : > { %1570 = vmatmul.mubr.msk.f32.vlgmr.msra.gmra.mxu1 %vm694_vm3, %v867_v5 }
 0x3e0   : > { %v1702_v7 = vpop.eup %1701  ;;  %1578 = vmatpush3.msra.mxu1 %v1035_v6  ;;  %1579 = vmatprep.mubr.msk.f32.mxu1 %vm1954_vm0, %v1953_v0 }
 0x3e1   : > { %1587 = vmatprep.subr.mxu1 %v1953_v0  ;;  %v1033_v8 = vmul.f32 %v1702_v7, %v1694_v56 }
 0x3e3   : > { %1580 = vmatmul.mubr.msk.f32.vlgmr.msra.gmra.mxu1 %vm694_vm3, %v1033_v8 }
 0x3e4   : > { %v1704_v10 = vpop.eup %1703  ;;  %1588 = vmatpush3.msra.mxu1 %v1200_v9  ;;  %1589 = vmatprep.mubr.msk.f32.mxu1 %vm1954_vm0, %v1953_v0 }
 0x3e5   : > { %v1198_v11 = vmul.f32 %v1704_v10, %v1696_v58 }
 0x3e7   : > { %1590 = vmatmul.mubr.msk.f32.vlgmr.msra.gmra.mxu1 %vm694_vm3, %v1198_v11 }
 0x437   : > { %v775_v12 = vpop.f32.mrf.mxu1 }
 0x439   : > { %v1561_v13 = vpop.f32.mrf.mxu1 }
 0x49f   : > { %v941_v14 = vpop.f32.mrf.mxu1 }
 0x4a0   : > { %1276 = vrot.lane.b32.xlu1 %v941_v14, %s1958_s10 }
 0x4a1   : > { %v1571_v15 = vpop.f32.mrf.mxu1 }
 0x4a3   : > { %v1106_v16 = vpop.f32.mrf.mxu1 }
 0x4a4   : > { %1280 = vrot.lane.b32.xlu0 %v1106_v16, %s1959_s24 }
 0x4a5   : > { %v1581_v17 = vpop.f32.mrf.mxu1 }
 0x4a7   : > { %v1271_v18 = vpop.f32.mrf.mxu1 }
 0x4a8   : > { %1284 = vrot.lane.b32.xlu1 %v1271_v18, %s1960_s28 }
 0x4a9   : > { %v1591_v0 = vpop.f32.mrf.mxu1 }
 0x512   : > { %v1277_v19 = vpop.permute.xlu1 %1276 }
 0x513   : > { %v1287_v21 = vsel %vm617_vm2, %v775_v12, %v1277_v19 }
 0x516   : > { %v1281_v20 = vpop.permute.xlu0 %1280 }
 0x517   : > { %v1288_v22 = vsel %vm389_vm1, %v1287_v21, %v1281_v20 }
 0x51a   : > { %v1285_v23 = vpop.permute.xlu1 %1284 }
 0x51b   : > { %v1290_v24 = vsel %vm1289_vm4, %v1288_v22, %v1285_v23 }
 0x51c   : > { %1292 = vst.msk [vmem:[%s381_s13] sm:$0xff] %vm1291_vm5, %v1290_v24 }
 0x51d   : > { %1880 = shalt.err (!%p1877_p11)
}
 0x51e   : > { %s1881_s29 = scalar_lea.hbm %s2320_s11, 128  ;;  %s1885_s30 = scalar_lea.hbm %s2363_s6, 256 }
 0x51f   : > { %p1882_p5 = scmp.ne.s32.totalorder %s2320_s11, %s1881_s29  ;;  %p1886_p2 = scmp.lt.s32.totalorder %s2320_s11, %s2363_s6 }
 0x520   : > { %p1887_p13 = scmp.lt.s32.totalorder %s1885_s30, %s1881_s29 }
 0x521   : > { %p1883_p10 = pnand %p1882_p5, %p2407_p7 }
 0x522   : > { %p1888_p1 = por %p1887_p13, %p1886_p2 }
 0x523   : > { %p1884_p9 = pneg %p1883_p10 }
 0x525   : > { %p1889_p12 = pnand %p1888_p1, %p1884_p9 }
 0x527   : > { %1892 = shalt.err (!%p1889_p12)
}
 0x528   : > { %1610 = dma.vmem_to_hbm [thread:$0]  (%p2407_p7), %s1308_s20, 128, %s2320_s11, %s1294_s7  }
 0x529 PF: > { %s2408_s1 = sld [smem:[#allocation20_spill]]  ;;  %s1319_s10 = sand.u32 1, %s1931_s21  }
 0x52a   : > { %s2409_s15 = sld [smem:[#allocation19_spill]]  ;;  %s1320_s24 = scalar_lea.sflag [#allocation4], %s1319_s10 }
 0x52f   : > { %p2410_p0 = scmp.ne.s32.totalorder %s2408_s1, 0 }
 0x530   : > { %p2411_p3 = scmp.ge.s32.totalorder %s2409_s15, 2 }
 0x532   : > { %p1633_p6 = pnand %p2411_p3, %p2410_p0 }
 0x534   : > { %p1634_p4 = pneg %p1633_p6 }
 0x536   : > { %1926 = dma.done.wait (%p1634_p4), %s1320_s24, 128  }
 0x537   : > { %1928 = vsyncadd (%p1634_p4), %s1320_s24, 4294967168  ;;  %s2412_s24 = sld [smem:[#allocation21_spill]]  ;;  %s2414_s21 = smov %s1935_s22 }
 0x538   : > { %s2413_s28 = sld [smem:[#allocation22_spill]]  ;;  %s2415_s22 = smov %s1939_s23 }
 0x53d   : > { %p24_p8 = scmp.ge.s32.totalorder %s2412_s24, 4  }
 0x53e   : > { %s2416_s23 = smov %s2413_s28 }
 0x53f   :  { %26 = sbr.rel (!%p24_p8) target bundleno = 12 (0xc), region = 125 }
 0x544   :  { %1325 = vsyncpa [#allocation3], 1 }
 0x545   :  { %1327 = vsyncpa [#allocation3 + $0x1], 1 }
 0x546   :  { %1328 = vsyncpa [#allocation6], 1 }
 0x547   :  { %1330 = vsyncpa [#allocation6 + $0x1], 1 }
 0x548   :  { %1331 = vsyncpa [#allocation9], 1 }
 0x549   :  { %1332 = vsyncpa [#allocation12], 1 }
 0x54a   :  { %1333 = vsyncpa [#allocation4], 1 }
 0x54b   :  { %1335 = vsyncpa [#allocation4 + $0x1], 1 }

</bundles_post_ra>
